<compile_context>
chip_gen: v6e
topology: v6e:2x2x1
jax: 0.10.0
libtpu: 0.0.40
codegen_flags: <defaults>
</compile_context>

<pallas_src>
import jax
import jax.numpy as jnp
from jax.experimental import pallas as pl
from jax.experimental.pallas import tpu as pltpu


# ---------------------------------------------------------------------------
# Kernels
# ---------------------------------------------------------------------------

def _dwblock_fc_kernel(x_ref, w_ref, b_ref, o_ref):
    """Large-batch path: one channel per grid step, TB batch rows per step."""
    # x_ref: (TB, N), w_ref: (N, N) (resident across batch tiles), b_ref: (1, N)
    acc = jnp.dot(x_ref[...], w_ref[...], preferred_element_type=jnp.float32)
    acc = acc + b_ref[...].astype(jnp.float32)           # (1, N) broadcasts over TB
    o_ref[...] = acc.astype(o_ref.dtype)


def _make_channel_block_kernel(tc):
    """Small-batch path: TC channels per grid step, full batch per step."""
    def kernel(x_ref, w_ref, b_ref, o_ref):
        # x_ref: (B, TC, N), w_ref: (TC, N, N), b_ref: (1, TC, N), o_ref: (B, TC, N)
        for t in range(tc):                               # static unroll, TC small
            acc = jnp.dot(x_ref[:, t, :], w_ref[t],
                          preferred_element_type=jnp.float32)
            acc = acc + b_ref[:, t, :].astype(jnp.float32)    # (1, N) broadcast
            o_ref[:, t, :] = acc.astype(o_ref.dtype)
    return kernel


# ---------------------------------------------------------------------------
# Wrapper
# ---------------------------------------------------------------------------

def _pick_channel_block(C, B, N, itemsize, budget_bytes=6 << 20):
    """Largest valid channel-group size TC for the small-B path (or None).

    TC must divide C and be either == C or a multiple of the sublane pack
    (8 f32 / 16 bf16 / 32 int8) to satisfy the (8,128) block-tiling rule,
    and the per-step block set (weight + x + out) must fit the VMEM budget.
    """
    sub = max(1, 32 // itemsize)
    per_channel = (N * N + 2 * B * N) * itemsize          # weight + x + out bytes
    cap = min(C, 32, max(1, budget_bytes // max(per_channel, 1)))
    if C <= cap:
        return C
    best = None
    t = sub
    while t <= cap:
        if C % t == 0:
            best = t
        t += sub
    return best


def depthwise_block_fc(x, weight, bias, *, tb_rows=1024, small_b_threshold=256):
    """x: (B, C, h, w) with h*w == N; weight: (C, N, N); bias: (C, N)."""
    shape = x.shape
    B, C = int(shape[0]), int(shape[1])
    N = 1
    for s in shape[2:]:
        N *= int(s)
    assert weight.shape == (C, N, N), (weight.shape, (C, N, N))
    assert bias.shape == (C, N), (bias.shape, (C, N))

    # dtype contract: matmul operands must match so the MXU runs one native pass.
    # Weight is the cheaper array to cast; never pre-cast x (extra HBM pass).
    if weight.dtype != x.dtype:
        weight = weight.astype(x.dtype)

    itemsize = jnp.dtype(x.dtype).itemsize
    x_flat = x.reshape(B, C, N)                           # free view, no transpose

    cost = pl.CostEstimate(
        flops=2 * B * C * N * N,
        transcendentals=0,
        bytes_accessed=(2 * B * C * N + C * N * N) * itemsize
                       + C * N * jnp.dtype(bias.dtype).itemsize)

    tc = None
    if B < small_b_threshold:
        tc = _pick_channel_block(C, B, N, itemsize)

    if tc is not None:
        # -------- small-batch path: TC channels per grid step --------
        bias3 = bias.reshape(1, C, N)                     # free view
        out = pl.pallas_call(
            _make_channel_block_kernel(tc),
            out_shape=jax.ShapeDtypeStruct((B, C, N), x.dtype),
            grid_spec=pltpu.PrefetchScalarGridSpec(
                num_scalar_prefetch=0,
                grid=(C // tc,),
                in_specs=[
                    pl.BlockSpec((B, tc, N), lambda g: (0, g, 0)),
                    pl.BlockSpec((tc, N, N), lambda g: (g, 0, 0)),
                    pl.BlockSpec((1, tc, N), lambda g: (0, g, 0)),
                ],
                out_specs=pl.BlockSpec((B, tc, N), lambda g: (0, g, 0)),
            ),
            compiler_params=pltpu.CompilerParams(
                dimension_semantics=("parallel",)),
            cost_estimate=cost,
        )(x_flat, weight, bias3)
        return out.reshape(shape)

    # -------- large-batch path: per-channel, batch-tiled --------
    bias3 = bias.reshape(C, 1, N)                         # free view
    sub = max(1, 32 // itemsize)                          # 8 f32 / 16 bf16
    TB = min(int(tb_rows), B)
    if TB >= sub:
        TB = (TB // sub) * sub

    def _footprint(tb):
        # double-buffered x + out tiles, double-buffered weight tile, bias
        return (2 * 2 * tb * N + 2 * N * N + 2 * N) * itemsize

    while TB > sub and _footprint(TB) > (48 << 20):       # stay under v7x VMEM
        TB = max(sub, (TB // 2 // sub) * sub)
    nb = pl.cdiv(B, TB)

    cp_kwargs = dict(dimension_semantics=("parallel", "parallel"))
    if _footprint(TB) > (14 << 20):                       # exceed scoped default
        cp_kwargs["vmem_limit_bytes"] = int(min(_footprint(TB) + (8 << 20),
                                                56 << 20))

    out = pl.pallas_call(
        _dwblock_fc_kernel,
        out_shape=jax.ShapeDtypeStruct((B, C, N), x.dtype),
        grid_spec=pltpu.PrefetchScalarGridSpec(
            num_scalar_prefetch=0,
            grid=(C, nb),                                 # channel outer, batch inner
            in_specs=[
                # x tile: TB batch rows of channel c (channel dim squeezed)
                pl.BlockSpec((TB, None, N), lambda c, i: (i, c, 0)),
                # weight / bias of channel c: index constant along the inner
                # batch axis -> resident in VMEM, one DMA per channel per core
                pl.BlockSpec((None, N, N), lambda c, i: (c, 0, 0)),
                pl.BlockSpec((None, 1, N), lambda c, i: (c, 0, 0)),
            ],
            out_specs=pl.BlockSpec((TB, None, N), lambda c, i: (i, c, 0)),
        ),
        compiler_params=pltpu.CompilerParams(**cp_kwargs),
        cost_estimate=cost,
    )(x_flat, weight, bias3)
    return out.reshape(shape)


# ---------------------------------------------------------------------------
# Reference + self-test
# ---------------------------------------------------------------------------

def _reference(x, weight, bias):
    shape = x.shape
    B, C = shape[0], shape[1]
    N = 1
    for s in shape[2:]:
        N *= int(s)
    xf = x.reshape(B, 1, C, N)
    y = jnp.einsum('bacn,cnm->bacm', xf, weight) + bias
    return y.reshape(shape)


if __name__ == "__main__":
    key = jax.random.PRNGKey(0)
    k1, k2, k3, k4, k5, k6 = jax.random.split(key, 6)

    # --- canonical small shape: batch=2, channels=4, block b=16 (N=256) ---
    B, C, b = 2, 4, 16
    N = b * b
    x = jax.random.normal(k1, (B, C, b, b), jnp.float32)
    weight = jax.random.normal(k2, (C, N, N), jnp.float32) / jnp.sqrt(N)
    bias = 0.1 * jax.random.normal(k3, (C, N), jnp.float32)

    y = depthwise_block_fc(x, weight, bias)
    jax.block_until_ready(y)
    y_ref = _reference(x, weight, bias)
    assert y.shape == x.shape and y.dtype == x.dtype
    assert jnp.allclose(y, y_ref, atol=1e-4, rtol=1e-4), \
        float(jnp.max(jnp.abs(y - y_ref)))

    # --- exercise the large-batch (per-channel, batch-tiled) path ---
    B2, C2 = 320, 2
    x2 = jax.random.normal(k4, (B2, C2, b, b), jnp.float32)
    w2 = jax.random.normal(k5, (C2, N, N), jnp.float32) / jnp.sqrt(N)
    b2 = 0.1 * jax.random.normal(k6, (C2, N), jnp.float32)
    y2 = depthwise_block_fc(x2, w2, b2)
    jax.block_until_ready(y2)
    y2_ref = _reference(x2, w2, b2)
    assert jnp.allclose(y2, y2_ref, atol=1e-4, rtol=1e-4), \
        float(jnp.max(jnp.abs(y2 - y2_ref)))

    # --- bf16 end-to-end (halves HBM bytes; accumulation stays f32) ---
    x_bf = x.astype(jnp.bfloat16)
    w_bf = weight.astype(jnp.bfloat16)
    bias_bf = bias.astype(jnp.bfloat16)
    y_bf = depthwise_block_fc(x_bf, w_bf, bias_bf)
    jax.block_until_ready(y_bf)
    y_bf_ref = _reference(x_bf.astype(jnp.float32), w_bf.astype(jnp.float32),
                          bias_bf.astype(jnp.float32))
    assert y_bf.dtype == jnp.bfloat16
    assert jnp.allclose(y_bf.astype(jnp.float32), y_bf_ref,
                        atol=5e-2, rtol=5e-2), \
        float(jnp.max(jnp.abs(y_bf.astype(jnp.float32) - y_bf_ref)))

    print("KERNEL_OK")
</pallas_src>

<mosaic_0001>
module attributes {stable_mosaic.version = 11 : i64} {
  func.func @kernel(%arg0: i32, %arg1: memref<2x4x256xf32, #tpu.memory_space<vmem>>, %arg2: memref<4x256x256xf32, #tpu.memory_space<vmem>>, %arg3: memref<1x4x256xf32, #tpu.memory_space<vmem>>, %arg4: memref<2x4x256xf32, #tpu.memory_space<vmem>>) attributes {dimension_semantics = [#tpu.dimension_semantics<parallel>], iteration_bounds = array<i64: 1>, scalar_prefetch = 0 : i64, scratch_operands = 0 : i64, tpu.core_type = #tpu.core_type<tc>, window_params = [{transform_indices = @transform_0, window_bounds = array<i64: 2, 4, 256>}, {transform_indices = @transform_1, window_bounds = array<i64: 4, 256, 256>}, {transform_indices = @transform_2, window_bounds = array<i64: 1, 4, 256>}, {transform_indices = @transform_3, window_bounds = array<i64: 2, 4, 256>}]} {
    %c0 = arith.constant 0 : index
    %c0_0 = arith.constant 0 : index
    %c0_1 = arith.constant 0 : index
    %0 = vector.load %arg1[%c0, %c0_0, %c0_1] : memref<2x4x256xf32, #tpu.memory_space<vmem>>, vector<2x1x256xf32>
    %1 = vector.shape_cast %0 : vector<2x1x256xf32> to vector<2x256xf32>
    %c0_2 = arith.constant 0 : index
    %c0_3 = arith.constant 0 : index
    %c0_4 = arith.constant 0 : index
    %2 = vector.load %arg2[%c0_2, %c0_3, %c0_4] : memref<4x256x256xf32, #tpu.memory_space<vmem>>, vector<1x256x256xf32>
    %3 = vector.shape_cast %2 : vector<1x256x256xf32> to vector<256x256xf32>
    %cst = arith.constant dense<0.000000e+00> : vector<2x256xf32>
    %4 = tpu.matmul %1, %3, %cst {dimension_numbers = #tpu.dot_dimension_numbers<[1], [0], [0], [1], [0, 0, 1, 1], [], []>} : vector<2x256xf32>, vector<256x256xf32>, vector<2x256xf32> -> vector<2x256xf32>
    %c0_5 = arith.constant 0 : index
    %c0_6 = arith.constant 0 : index
    %c0_7 = arith.constant 0 : index
    %5 = vector.load %arg3[%c0_5, %c0_6, %c0_7] : memref<1x4x256xf32, #tpu.memory_space<vmem>>, vector<1x1x256xf32>
    %6 = vector.shape_cast %5 : vector<1x1x256xf32> to vector<1x256xf32>
    %7 = vector.broadcast %6 : vector<1x256xf32> to vector<2x256xf32>
    %8 = arith.addf %4, %7 : vector<2x256xf32>
    %c0_8 = arith.constant 0 : index
    %c0_9 = arith.constant 0 : index
    %c0_10 = arith.constant 0 : index
    %9 = vector.load %arg4[%c0_8, %c0_9, %c0_10] : memref<2x4x256xf32, #tpu.memory_space<vmem>>, vector<2x1x256xf32>
    %10 = vector.shape_cast %9 : vector<2x1x256xf32> to vector<2x256xf32>
    %11 = vector.shape_cast %8 : vector<2x256xf32> to vector<2x1x256xf32>
    tpu.vector_store %arg4[%c0_8, %c0_9, %c0_10], %11 {strides = array<i32>} : memref<2x4x256xf32, #tpu.memory_space<vmem>>, vector<2x1x256xf32>,
    %c0_11 = arith.constant 0 : index
    %c1 = arith.constant 1 : index
    %c0_12 = arith.constant 0 : index
    %12 = vector.load %arg1[%c0_11, %c1, %c0_12] : memref<2x4x256xf32, #tpu.memory_space<vmem>>, vector<2x1x256xf32>
    %13 = vector.shape_cast %12 : vector<2x1x256xf32> to vector<2x256xf32>
    %c1_13 = arith.constant 1 : index
    %c0_14 = arith.constant 0 : index
    %c0_15 = arith.constant 0 : index
    %14 = vector.load %arg2[%c1_13, %c0_14, %c0_15] : memref<4x256x256xf32, #tpu.memory_space<vmem>>, vector<1x256x256xf32>
    %15 = vector.shape_cast %14 : vector<1x256x256xf32> to vector<256x256xf32>
    %cst_16 = arith.constant dense<0.000000e+00> : vector<2x256xf32>
    %16 = tpu.matmul %13, %15, %cst_16 {dimension_numbers = #tpu.dot_dimension_numbers<[1], [0], [0], [1], [0, 0, 1, 1], [], []>} : vector<2x256xf32>, vector<256x256xf32>, vector<2x256xf32> -> vector<2x256xf32>
    %c0_17 = arith.constant 0 : index
    %c1_18 = arith.constant 1 : index
    %c0_19 = arith.constant 0 : index
    %17 = vector.load %arg3[%c0_17, %c1_18, %c0_19] : memref<1x4x256xf32, #tpu.memory_space<vmem>>, vector<1x1x256xf32>
    %18 = vector.shape_cast %17 : vector<1x1x256xf32> to vector<1x256xf32>
    %19 = vector.broadcast %18 : vector<1x256xf32> to vector<2x256xf32>
    %20 = arith.addf %16, %19 : vector<2x256xf32>
    %c0_20 = arith.constant 0 : index
    %c1_21 = arith.constant 1 : index
    %c0_22 = arith.constant 0 : index
    %21 = vector.load %arg4[%c0_20, %c1_21, %c0_22] : memref<2x4x256xf32, #tpu.memory_space<vmem>>, vector<2x1x256xf32>
    %22 = vector.shape_cast %21 : vector<2x1x256xf32> to vector<2x256xf32>
    %23 = vector.shape_cast %20 : vector<2x256xf32> to vector<2x1x256xf32>
    tpu.vector_store %arg4[%c0_20, %c1_21, %c0_22], %23 {strides = array<i32>} : memref<2x4x256xf32, #tpu.memory_space<vmem>>, vector<2x1x256xf32>,
    %c0_23 = arith.constant 0 : index
    %c2 = arith.constant 2 : index
    %c0_24 = arith.constant 0 : index
    %24 = vector.load %arg1[%c0_23, %c2, %c0_24] : memref<2x4x256xf32, #tpu.memory_space<vmem>>, vector<2x1x256xf32>
    %25 = vector.shape_cast %24 : vector<2x1x256xf32> to vector<2x256xf32>
    %c2_25 = arith.constant 2 : index
    %c0_26 = arith.constant 0 : index
    %c0_27 = arith.constant 0 : index
    %26 = vector.load %arg2[%c2_25, %c0_26, %c0_27] : memref<4x256x256xf32, #tpu.memory_space<vmem>>, vector<1x256x256xf32>
    %27 = vector.shape_cast %26 : vector<1x256x256xf32> to vector<256x256xf32>
    %cst_28 = arith.constant dense<0.000000e+00> : vector<2x256xf32>
    %28 = tpu.matmul %25, %27, %cst_28 {dimension_numbers = #tpu.dot_dimension_numbers<[1], [0], [0], [1], [0, 0, 1, 1], [], []>} : vector<2x256xf32>, vector<256x256xf32>, vector<2x256xf32> -> vector<2x256xf32>
    %c0_29 = arith.constant 0 : index
    %c2_30 = arith.constant 2 : index
    %c0_31 = arith.constant 0 : index
    %29 = vector.load %arg3[%c0_29, %c2_30, %c0_31] : memref<1x4x256xf32, #tpu.memory_space<vmem>>, vector<1x1x256xf32>
    %30 = vector.shape_cast %29 : vector<1x1x256xf32> to vector<1x256xf32>
    %31 = vector.broadcast %30 : vector<1x256xf32> to vector<2x256xf32>
    %32 = arith.addf %28, %31 : vector<2x256xf32>
    %c0_32 = arith.constant 0 : index
    %c2_33 = arith.constant 2 : index
    %c0_34 = arith.constant 0 : index
    %33 = vector.load %arg4[%c0_32, %c2_33, %c0_34] : memref<2x4x256xf32, #tpu.memory_space<vmem>>, vector<2x1x256xf32>
    %34 = vector.shape_cast %33 : vector<2x1x256xf32> to vector<2x256xf32>
    %35 = vector.shape_cast %32 : vector<2x256xf32> to vector<2x1x256xf32>
    tpu.vector_store %arg4[%c0_32, %c2_33, %c0_34], %35 {strides = array<i32>} : memref<2x4x256xf32, #tpu.memory_space<vmem>>, vector<2x1x256xf32>,
    %c0_35 = arith.constant 0 : index
    %c3 = arith.constant 3 : index
    %c0_36 = arith.constant 0 : index
    %36 = vector.load %arg1[%c0_35, %c3, %c0_36] : memref<2x4x256xf32, #tpu.memory_space<vmem>>, vector<2x1x256xf32>
    %37 = vector.shape_cast %36 : vector<2x1x256xf32> to vector<2x256xf32>
    %c3_37 = arith.constant 3 : index
    %c0_38 = arith.constant 0 : index
    %c0_39 = arith.constant 0 : index
    %38 = vector.load %arg2[%c3_37, %c0_38, %c0_39] : memref<4x256x256xf32, #tpu.memory_space<vmem>>, vector<1x256x256xf32>
    %39 = vector.shape_cast %38 : vector<1x256x256xf32> to vector<256x256xf32>
    %cst_40 = arith.constant dense<0.000000e+00> : vector<2x256xf32>
    %40 = tpu.matmul %37, %39, %cst_40 {dimension_numbers = #tpu.dot_dimension_numbers<[1], [0], [0], [1], [0, 0, 1, 1], [], []>} : vector<2x256xf32>, vector<256x256xf32>, vector<2x256xf32> -> vector<2x256xf32>
    %c0_41 = arith.constant 0 : index
    %c3_42 = arith.constant 3 : index
    %c0_43 = arith.constant 0 : index
    %41 = vector.load %arg3[%c0_41, %c3_42, %c0_43] : memref<1x4x256xf32, #tpu.memory_space<vmem>>, vector<1x1x256xf32>
    %42 = vector.shape_cast %41 : vector<1x1x256xf32> to vector<1x256xf32>
    %43 = vector.broadcast %42 : vector<1x256xf32> to vector<2x256xf32>
    %44 = arith.addf %40, %43 : vector<2x256xf32>
    %c0_44 = arith.constant 0 : index
    %c3_45 = arith.constant 3 : index
    %c0_46 = arith.constant 0 : index
    %45 = vector.load %arg4[%c0_44, %c3_45, %c0_46] : memref<2x4x256xf32, #tpu.memory_space<vmem>>, vector<2x1x256xf32>
    %46 = vector.shape_cast %45 : vector<2x1x256xf32> to vector<2x256xf32>
    %47 = vector.shape_cast %44 : vector<2x256xf32> to vector<2x1x256xf32>
    tpu.vector_store %arg4[%c0_44, %c3_45, %c0_46], %47 {strides = array<i32>} : memref<2x4x256xf32, #tpu.memory_space<vmem>>, vector<2x1x256xf32>,
    return
  }
  func.func @transform_0(%arg0: i32) -> (i32, i32, i32) {
    %c0_i32 = arith.constant 0 : i32
    %c0_i32_0 = arith.constant 0 : i32
    %c0_i32_1 = arith.constant 0 : i32
    return %c0_i32, %arg0, %c0_i32_0 : i32, i32, i32
  }
  func.func @transform_1(%arg0: i32) -> (i32, i32, i32) {
    %c0_i32 = arith.constant 0 : i32
    %c0_i32_0 = arith.constant 0 : i32
    %c0_i32_1 = arith.constant 0 : i32
    return %arg0, %c0_i32, %c0_i32_0 : i32, i32, i32
  }
  func.func @transform_2(%arg0: i32) -> (i32, i32, i32) {
    %c0_i32 = arith.constant 0 : i32
    %c0_i32_0 = arith.constant 0 : i32
    %c0_i32_1 = arith.constant 0 : i32
    return %c0_i32, %arg0, %c0_i32_0 : i32, i32, i32
  }
  func.func @transform_3(%arg0: i32) -> (i32, i32, i32) {
    %c0_i32 = arith.constant 0 : i32
    %c0_i32_0 = arith.constant 0 : i32
    %c0_i32_1 = arith.constant 0 : i32
    return %c0_i32, %arg0, %c0_i32_0 : i32, i32, i32
  }
}

</mosaic_0001>

<bundles_post_ra>
// kernel: tpu_custom_call.1
= control target key start
LH: loop header
LB: loop body
LE: loop exit
PB: predicated region body
PF: predicated region fallthrough
CT: control target
= control target key end

     0   :  { %8 = vsyncpa [#allocation3], 0  ;;  %s1111_s0 = inlined_call_operand.hbm [shape: f32[2,4,256], index: 0, kind: input, shape index: {}]   ;;  %s1112_s1 = inlined_call_operand.hbm [shape: f32[4,256,256], index: 1, kind: input, shape index: {}]   ;;  %s1113_s2 = inlined_call_operand.hbm [shape: f32[1,4,256], index: 2, kind: input, shape index: {}]   ;;  %s1114_s3 = inlined_call_operand.hbm [shape: f32[2,4,256], index: 3, kind: output, shape index: {}]  }
   0x1   :  { %9 = vsyncpa [#allocation6], 0 }
   0x2   :  { %10 = vsyncpa [#allocation4], 0  ;;  %s1011_s12 = smov [#allocation5]  }
   0x3   :  { %s28_s13 = sshll.u32 %s1011_s12, 4  ;;  %s29_s13 = int_to_ptr.vmem [resolvable:$true] %s28_s13 }
   0x4   :  { %s933_s14 = scalar_lea.vmem %s29_s13, 32768  ;;  %p938_p1 = scmp.lt.s32.totalorder %s29_s13, %s29_s13 }
   0x5   :  { %p934_p0 = scmp.ne.s32.totalorder %s29_s13, %s933_s14  ;;  %p939_p2 = scmp.lt.s32.totalorder %s933_s14, %s933_s14 }
   0x7   :  { %p940_p3 = por %p939_p2, %p938_p1 }
   0x9   :  { %p941_p4 = pnand %p940_p3, %p934_p0 }
   0xb   :  { %944 = shalt.err (!%p941_p4)
}
   0xc   :  { %s1012_s15 = smov 256   ;;  %s1013_s16 = smov 16  }
   0xd   :  { %34 = dma.hbm_to_vmem [thread:$0]  %s1112_s1, 32768, %s29_s13, [#allocation6], %s1012_s15, %s1012_s15, %s1013_s16  }
   0xe   :  { %s1014_s19 = smov [#allocation2]  }
   0xf   :  { %s16_s20 = sshll.u32 %s1014_s19, 4  ;;  %s17_s20 = int_to_ptr.vmem [resolvable:$true] %s16_s20 }
  0x10   :  { %s953_s21 = scalar_lea.vmem %s17_s20, 256  ;;  %p958_p6 = scmp.lt.s32.totalorder %s17_s20, %s17_s20 }
  0x11   :  { %p954_p5 = scmp.ne.s32.totalorder %s17_s20, %s953_s21  ;;  %p959_p7 = scmp.lt.s32.totalorder %s953_s21, %s953_s21 }
  0x13   :  { %p960_p8 = por %p959_p7, %p958_p6 }
  0x15   :  { %p961_p9 = pnand %p960_p8, %p954_p5 }
  0x17   :  { %964 = shalt.err (!%p961_p9)
}
  0x18   :  { %s1015_s22 = smov 128   ;;  %s1016_s23 = smov 8  }
  0x19   :  { %22 = dma.hbm_to_vmem [thread:$0]  %s1111_s0, 256, %s17_s20, [#allocation3], %s1015_s22, %s1015_s22, %s1016_s23  }
  0x1a   :  { %s1017_s1 = smov [#allocation7]  }
  0x1b   :  { %s41_s26 = sshll.u32 %s1017_s1, 4  ;;  %s42_s26 = int_to_ptr.vmem [resolvable:$true] %s41_s26 }
  0x1c   :  { %s973_s27 = scalar_lea.vmem %s42_s26, 128  ;;  %p978_p11 = scmp.lt.s32.totalorder %s42_s26, %s42_s26 }
  0x1d   :  { %p974_p10 = scmp.ne.s32.totalorder %s42_s26, %s973_s27  ;;  %p979_p12 = scmp.lt.s32.totalorder %s973_s27, %s973_s27 }
  0x1f   :  { %p980_p13 = por %p979_p12, %p978_p11 }
  0x21   :  { %p981_p0 = pnand %p980_p13, %p974_p10 }
  0x23   :  { %984 = shalt.err (!%p981_p0)
}
  0x24   :  { %44 = dma.hbm_to_vmem [thread:$0]  %s1113_s2, 128, %s42_s26, [#allocation6]  }
  0x25   :  { %1005 = dma.done.wait [#allocation3], 256  }
  0x26   :  { %1006 = vsyncadd [#allocation3], 4294967040 }
  0x27   :  { %1007 = dma.done.wait [#allocation6], 32896  }
  0x28   :  { %1008 = vsyncadd [#allocation6], 4294934400  ;;  %v88_v0 = vld [vmem:[#allocation5 + $0xf8] sm:$0xff]  ;;  %v87_v2 = vld [vmem:[#allocation5 + $0xf0] sm:$0xff]  ;;  %s1019_s0 = smov [#allocation8]  }
  0x29   :  { %v301_v1 = vld [vmem:[#allocation5 + $0x2f8] sm:$0xff]  ;;  %160 = vmatprep.subr.mxu0 %v88_v0  ;;  %v300_v3 = vld [vmem:[#allocation5 + $0x2f0] sm:$0xff]  ;;  %v86_v4 = vld [vmem:[#allocation5 + $0xe8] sm:$0xff]  ;;  %s903_s2 = sshll.u32 %s1019_s0, 4  ;;  %s904_s2 = int_to_ptr.vmem [resolvable:$true] %s903_s2 }
  0x2a   :  { %374 = vmatprep.subr.mxu1 %v301_v1  ;;  %v299_v5 = vld [vmem:[#allocation5 + $0x2e8] sm:$0xff]  ;;  %161 = vmatpush1.msra.mxu0 %v87_v2  ;;  %v85_v6 = vld [vmem:[#allocation5 + $0xe0] sm:$0xff]  ;;  %v84_v8 = vld [vmem:[#allocation5 + $0xd8] sm:$0xff]  ;;  %s985_s30 = scalar_lea.vmem %s904_s2, 256  ;;  %p990_p2 = scmp.lt.s32.totalorder %s904_s2, %s904_s2 }
  0x2b   :  { %375 = vmatpush1.msra.mxu1 %v300_v3  ;;  %v298_v7 = vld [vmem:[#allocation5 + $0x2e0] sm:$0xff]  ;;  %162 = vmatprep.subr.mxu0 %v86_v4  ;;  %v297_v9 = vld [vmem:[#allocation5 + $0x2d8] sm:$0xff]  ;;  %v83_v10 = vld [vmem:[#allocation5 + $0xd0] sm:$0xff]  ;;  %p986_p1 = scmp.ne.s32.totalorder %s904_s2, %s985_s30  ;;  %p991_p3 = scmp.lt.s32.totalorder %s985_s30, %s985_s30 }
  0x2c   :  { %376 = vmatprep.subr.mxu1 %v299_v5  ;;  %v296_v11 = vld [vmem:[#allocation5 + $0x2d0] sm:$0xff]  ;;  %163 = vmatpush1.msra.mxu0 %v85_v6  ;;  %v82_v12 = vld [vmem:[#allocation5 + $0xc8] sm:$0xff]  ;;  %v81_v14 = vld [vmem:[#allocation5 + $0xc0] sm:$0xff] }
  0x2d   :  { %377 = vmatpush1.msra.mxu1 %v298_v7  ;;  %v295_v13 = vld [vmem:[#allocation5 + $0x2c8] sm:$0xff]  ;;  %164 = vmatprep.subr.mxu0 %v84_v8  ;;  %v294_v15 = vld [vmem:[#allocation5 + $0x2c0] sm:$0xff]  ;;  %v80_v16 = vld [vmem:[#allocation5 + $0xb8] sm:$0xff]  ;;  %p992_p4 = por %p991_p3, %p990_p2 }
  0x2e   :  { %378 = vmatprep.subr.mxu1 %v297_v9  ;;  %165 = vmatpush1.msra.mxu0 %v83_v10  ;;  %v293_v17 = vld [vmem:[#allocation5 + $0x2b8] sm:$0xff]  ;;  %v79_v18 = vld [vmem:[#allocation5 + $0xb0] sm:$0xff]  ;;  %v78_v20 = vld [vmem:[#allocation5 + $0xa8] sm:$0xff] }
  0x2f   :  { %379 = vmatpush1.msra.mxu1 %v296_v11  ;;  %166 = vmatprep.subr.mxu0 %v82_v12  ;;  %v292_v19 = vld [vmem:[#allocation5 + $0x2b0] sm:$0xff]  ;;  %v291_v21 = vld [vmem:[#allocation5 + $0x2a8] sm:$0xff]  ;;  %v77_v22 = vld [vmem:[#allocation5 + $0xa0] sm:$0xff]  ;;  %p993_p5 = pnand %p992_p4, %p986_p1 }
  0x30   :  { %380 = vmatprep.subr.mxu1 %v295_v13  ;;  %167 = vmatpush1.msra.mxu0 %v81_v14  ;;  %v290_v23 = vld [vmem:[#allocation5 + $0x2a0] sm:$0xff]  ;;  %v76_v24 = vld [vmem:[#allocation5 + $0x98] sm:$0xff]  ;;  %v75_v26 = vld [vmem:[#allocation5 + $0x90] sm:$0xff] }
  0x31   :  { %381 = vmatpush1.msra.mxu1 %v294_v15  ;;  %168 = vmatprep.subr.mxu0 %v80_v16  ;;  %v289_v25 = vld [vmem:[#allocation5 + $0x298] sm:$0xff]  ;;  %v288_v27 = vld [vmem:[#allocation5 + $0x290] sm:$0xff]  ;;  %v74_v28 = vld [vmem:[#allocation5 + $0x88] sm:$0xff] }
  0x32   :  { %382 = vmatprep.subr.mxu1 %v293_v17  ;;  %169 = vmatpush1.msra.mxu0 %v79_v18  ;;  %v287_v29 = vld [vmem:[#allocation5 + $0x288] sm:$0xff]  ;;  %v73_v30 = vld [vmem:[#allocation5 + $0x80] sm:$0xff]  ;;  %v72_v32 = vld [vmem:[#allocation5 + $0x78] sm:$0xff] }
  0x33   :  { %383 = vmatpush1.msra.mxu1 %v292_v19  ;;  %170 = vmatprep.subr.mxu0 %v78_v20  ;;  %v286_v31 = vld [vmem:[#allocation5 + $0x280] sm:$0xff]  ;;  %v285_v33 = vld [vmem:[#allocation5 + $0x278] sm:$0xff]  ;;  %v71_v34 = vld [vmem:[#allocation5 + $0x70] sm:$0xff] }
  0x34   :  { %384 = vmatprep.subr.mxu1 %v291_v21  ;;  %171 = vmatpush1.msra.mxu0 %v77_v22  ;;  %v284_v35 = vld [vmem:[#allocation5 + $0x270] sm:$0xff]  ;;  %v70_v36 = vld [vmem:[#allocation5 + $0x68] sm:$0xff]  ;;  %v69_v38 = vld [vmem:[#allocation5 + $0x60] sm:$0xff]  ;;  %v123_v22 = vlaneseq }
  0x35   :  { %385 = vmatpush1.msra.mxu1 %v290_v23  ;;  %172 = vmatprep.subr.mxu0 %v76_v24  ;;  %v283_v37 = vld [vmem:[#allocation5 + $0x268] sm:$0xff]  ;;  %v282_v39 = vld [vmem:[#allocation5 + $0x260] sm:$0xff]  ;;  %v68_v40 = vld [vmem:[#allocation5 + $0x58] sm:$0xff]  ;;  %v1018_v23 = vmov 1966171168  }
  0x36   :  { %386 = vmatprep.subr.mxu1 %v289_v25  ;;  %173 = vmatpush1.msra.mxu0 %v75_v26  ;;  %v281_v41 = vld [vmem:[#allocation5 + $0x258] sm:$0xff]  ;;  %v67_v42 = vld [vmem:[#allocation5 + $0x50] sm:$0xff]  ;;  %v66_v44 = vld [vmem:[#allocation5 + $0x48] sm:$0xff]  ;;  %v137_v24 = vunpack.c.l.s4 %v1018_v23  ;;  %vm1075_vm0 = vcmp.lt.s32.totalorder %v123_v22, 256 }
  0x37   :  { %387 = vmatpush1.msra.mxu1 %v288_v27  ;;  %174 = vmatprep.subr.mxu0 %v74_v28  ;;  %v280_v43 = vld [vmem:[#allocation5 + $0x250] sm:$0xff]  ;;  %v279_v45 = vld [vmem:[#allocation5 + $0x248] sm:$0xff]  ;;  %v65_v46 = vld [vmem:[#allocation5 + $0x40] sm:$0xff] }
  0x38   :  { %388 = vmatprep.subr.mxu1 %v287_v29  ;;  %175 = vmatpush1.msra.mxu0 %v73_v30  ;;  %v278_v47 = vld [vmem:[#allocation5 + $0x240] sm:$0xff]  ;;  %v64_v48 = vld [vmem:[#allocation5 + $0x38] sm:$0xff]  ;;  %v63_v50 = vld [vmem:[#allocation5 + $0x30] sm:$0xff] }
  0x39   :  { %389 = vmatpush1.msra.mxu1 %v286_v31  ;;  %176 = vmatprep.subr.mxu0 %v72_v32  ;;  %v277_v49 = vld [vmem:[#allocation5 + $0x238] sm:$0xff]  ;;  %v276_v51 = vld [vmem:[#allocation5 + $0x230] sm:$0xff]  ;;  %v62_v52 = vld [vmem:[#allocation5 + $0x28] sm:$0xff] }
  0x3a   :  { %390 = vmatprep.subr.mxu1 %v285_v33  ;;  %177 = vmatpush1.msra.mxu0 %v71_v34  ;;  %v275_v53 = vld [vmem:[#allocation5 + $0x228] sm:$0xff]  ;;  %v61_v54 = vld [vmem:[#allocation5 + $0x20] sm:$0xff]  ;;  %v60_v56 = vld [vmem:[#allocation5 + $0x18] sm:$0xff] }
  0x3b   :  { %391 = vmatpush1.msra.mxu1 %v284_v35  ;;  %178 = vmatprep.subr.mxu0 %v70_v36  ;;  %v274_v55 = vld [vmem:[#allocation5 + $0x220] sm:$0xff]  ;;  %v273_v57 = vld [vmem:[#allocation5 + $0x218] sm:$0xff]  ;;  %v59_v58 = vld [vmem:[#allocation5 + $0x10] sm:$0xff] }
  0x3c   :  { %392 = vmatprep.subr.mxu1 %v283_v37  ;;  %179 = vmatpush1.msra.mxu0 %v69_v38  ;;  %v272_v59 = vld [vmem:[#allocation5 + $0x210] sm:$0xff]  ;;  %v58_v60 = vld [vmem:[#allocation5 + $0x8] sm:$0xff]  ;;  %v57_v62 = vld [vmem:[#allocation5] sm:$0xff]  ;;  %v1053_v37 = vshrl.u32 %v123_v22, 7  ;;  %v138_v38 = vunpack.c.0.s8 %v137_v24 }
  0x3d   :  { %393 = vmatpush1.msra.mxu1 %v282_v39  ;;  %180 = vmatprep.subr.mxu0 %v68_v40  ;;  %v271_v61 = vld [vmem:[#allocation5 + $0x208] sm:$0xff]  ;;  %v270_v63 = vld [vmem:[#allocation5 + $0x200] sm:$0xff]  ;;  %v120_v0 = vld [vmem:[#allocation5 + $0x1f8] sm:$0xff] }
  0x3e   :  { %394 = vmatprep.subr.mxu1 %v281_v41  ;;  %181 = vmatpush1.msra.mxu0 %v67_v42  ;;  %v333_v1 = vld [vmem:[#allocation5 + $0x3f8] sm:$0xff]  ;;  %v119_v2 = vld [vmem:[#allocation5 + $0x1f0] sm:$0xff]  ;;  %v118_v4 = vld [vmem:[#allocation5 + $0x1e8] sm:$0xff] }
  0x3f   :  { %395 = vmatpush1.msra.mxu1 %v280_v43  ;;  %182 = vmatprep.subr.mxu0 %v66_v44  ;;  %v332_v3 = vld [vmem:[#allocation5 + $0x3f0] sm:$0xff]  ;;  %v331_v5 = vld [vmem:[#allocation5 + $0x3e8] sm:$0xff]  ;;  %v117_v6 = vld [vmem:[#allocation5 + $0x1e0] sm:$0xff] }
  0x40   :  { %396 = vmatprep.subr.mxu1 %v279_v45  ;;  %183 = vmatpush1.msra.mxu0 %v65_v46  ;;  %v330_v7 = vld [vmem:[#allocation5 + $0x3e0] sm:$0xff]  ;;  %v116_v8 = vld [vmem:[#allocation5 + $0x1d8] sm:$0xff]  ;;  %v115_v10 = vld [vmem:[#allocation5 + $0x1d0] sm:$0xff] }
  0x41   :  { %397 = vmatpush1.msra.mxu1 %v278_v47  ;;  %184 = vmatprep.subr.mxu0 %v64_v48  ;;  %v329_v9 = vld [vmem:[#allocation5 + $0x3d8] sm:$0xff]  ;;  %v328_v11 = vld [vmem:[#allocation5 + $0x3d0] sm:$0xff]  ;;  %v114_v12 = vld [vmem:[#allocation5 + $0x1c8] sm:$0xff]  ;;  %v1056_v48 = vsub.s32 %v138_v38, %v1053_v37 }
  0x42   :  { %398 = vmatprep.subr.mxu1 %v277_v49  ;;  %185 = vmatpush1.msra.mxu0 %v63_v50  ;;  %v327_v13 = vld [vmem:[#allocation5 + $0x3c8] sm:$0xff]  ;;  %v113_v14 = vld [vmem:[#allocation5 + $0x1c0] sm:$0xff]  ;;  %v112_v16 = vld [vmem:[#allocation5 + $0x1b8] sm:$0xff] }
  0x43   :  { %399 = vmatpush1.msra.mxu1 %v276_v51  ;;  %186 = vmatprep.subr.mxu0 %v62_v52  ;;  %v326_v15 = vld [vmem:[#allocation5 + $0x3c0] sm:$0xff]  ;;  %v325_v17 = vld [vmem:[#allocation5 + $0x3b8] sm:$0xff]  ;;  %v111_v18 = vld [vmem:[#allocation5 + $0x1b0] sm:$0xff] }
  0x44   :  { %400 = vmatprep.subr.mxu1 %v275_v53  ;;  %187 = vmatpush1.msra.mxu0 %v61_v54  ;;  %v324_v19 = vld [vmem:[#allocation5 + $0x3b0] sm:$0xff]  ;;  %v110_v20 = vld [vmem:[#allocation5 + $0x1a8] sm:$0xff]  ;;  %v109_v25 = vld [vmem:[#allocation5 + $0x1a0] sm:$0xff] }
  0x45   :  { %401 = vmatpush1.msra.mxu1 %v274_v55  ;;  %188 = vmatprep.subr.mxu0 %v60_v56  ;;  %v323_v21 = vld [vmem:[#allocation5 + $0x3a8] sm:$0xff]  ;;  %v322_v26 = vld [vmem:[#allocation5 + $0x3a0] sm:$0xff]  ;;  %v108_v27 = vld [vmem:[#allocation5 + $0x198] sm:$0xff] }
  0x46   :  { %402 = vmatprep.subr.mxu1 %v273_v57  ;;  %189 = vmatpush1.msra.mxu0 %v59_v58  ;;  %v321_v28 = vld [vmem:[#allocation5 + $0x398] sm:$0xff]  ;;  %v107_v29 = vld [vmem:[#allocation5 + $0x190] sm:$0xff]  ;;  %v106_v31 = vld [vmem:[#allocation5 + $0x188] sm:$0xff] }
  0x47   :  { %403 = vmatpush1.msra.mxu1 %v272_v59  ;;  %190 = vmatprep.subr.mxu0 %v58_v60  ;;  %v320_v30 = vld [vmem:[#allocation5 + $0x390] sm:$0xff]  ;;  %v319_v32 = vld [vmem:[#allocation5 + $0x388] sm:$0xff]  ;;  %v105_v33 = vld [vmem:[#allocation5 + $0x180] sm:$0xff] }
  0x48   :  { %404 = vmatprep.subr.mxu1 %v271_v61  ;;  %191 = vmatpush1.msra.mxu0 %v57_v62  ;;  %v318_v34 = vld [vmem:[#allocation5 + $0x380] sm:$0xff]  ;;  %v104_v35 = vld [vmem:[#allocation5 + $0x178] sm:$0xff]  ;;  %v54_v39 = vld [vmem:[#allocation2] ss:$4 sm:$0x3] }
  0x49   :  { %405 = vmatpush1.msra.mxu1 %v270_v63  ;;  %192 = vmatprep.subr.mxu0 %v120_v0  ;;  %v317_v36 = vld [vmem:[#allocation5 + $0x378] sm:$0xff]  ;;  %v266_v41 = vld [vmem:[#allocation2 + $0x1] ss:$4 sm:$0x3]  ;;  %v102_v45 = vld [vmem:[#allocation5 + $0x168] sm:$0xff] }
  0x4a   :  { %406 = vmatprep.subr.mxu1 %v333_v1  ;;  %193 = vmatpush2.msra.mxu0 %v119_v2  ;;  %v56_v40 = vld [vmem:[#allocation2 + $0x8] ss:$4 sm:$0x3]  ;;  %v268_v42 = vld [vmem:[#allocation2 + $0x9] ss:$4 sm:$0x3] }
  0x4b   :  { %407 = vmatpush2.msra.mxu1 %v332_v3  ;;  %194 = vmatprep.subr.mxu0 %v118_v4  ;;  %v103_v43 = vld [vmem:[#allocation5 + $0x170] sm:$0xff]  ;;  %v315_v46 = vld [vmem:[#allocation5 + $0x368] sm:$0xff]  ;;  %v135_v47 = vcombine.low %v54_v39, %v56_v40  ;;  %v101_v49 = vld [vmem:[#allocation5 + $0x160] sm:$0xff]  ;;  %v349_v51 = vcombine.low %v266_v41, %v268_v42 }
  0x4c   :  { %408 = vmatprep.subr.mxu1 %v331_v5  ;;  %195 = vmatpush2.msra.mxu0 %v117_v6  ;;  %v316_v44 = vld [vmem:[#allocation5 + $0x370] sm:$0xff]  ;;  %v314_v50 = vld [vmem:[#allocation5 + $0x360] sm:$0xff]  ;;  %v100_v52 = vld [vmem:[#allocation5 + $0x158] sm:$0xff] }
  0x4d   :  { %409 = vmatpush2.msra.mxu1 %v330_v7  ;;  %196 = vmatprep.subr.mxu0 %v116_v8  ;;  %v313_v53 = vld [vmem:[#allocation5 + $0x358] sm:$0xff]  ;;  %v99_v54 = vld [vmem:[#allocation5 + $0x150] sm:$0xff]  ;;  %v98_v56 = vld [vmem:[#allocation5 + $0x148] sm:$0xff]  ;;  %v142_v58 = vrot.slane %v135_v47, %v1056_v48  ;;  %v356_v61 = vrot.slane %v349_v51, %v1056_v48 }
  0x4e   :  { %410 = vmatprep.subr.mxu1 %v329_v9  ;;  %197 = vmatpush2.msra.mxu0 %v115_v10  ;;  %v312_v55 = vld [vmem:[#allocation5 + $0x350] sm:$0xff]  ;;  %v311_v57 = vld [vmem:[#allocation5 + $0x348] sm:$0xff]  ;;  %v97_v59 = vld [vmem:[#allocation5 + $0x140] sm:$0xff] }
  0x4f   :  { %411 = vmatpush2.msra.mxu1 %v328_v11  ;;  %198 = vmatprep.subr.mxu0 %v114_v12  ;;  %v310_v60 = vld [vmem:[#allocation5 + $0x340] sm:$0xff]  ;;  %v96_v62 = vld [vmem:[#allocation5 + $0x138] sm:$0xff]  ;;  %v95_v0 = vld [vmem:[#allocation5 + $0x130] sm:$0xff]  ;;  %v143_v4 = vcombine.high %v142_v58, %v142_v58  ;;  %v357_v7 = vcombine.high %v356_v61, %v356_v61 }
  0x50   :  { %412 = vmatprep.subr.mxu1 %v327_v13  ;;  %199 = vmatpush2.msra.mxu0 %v113_v14  ;;  %v309_v63 = vld [vmem:[#allocation5 + $0x338] sm:$0xff]  ;;  %v308_v1 = vld [vmem:[#allocation5 + $0x330] sm:$0xff]  ;;  %v94_v2 = vld [vmem:[#allocation5 + $0x128] sm:$0xff] }
  0x51   :  { %413 = vmatpush2.msra.mxu1 %v326_v15  ;;  %200 = vmatprep.subr.mxu0 %v112_v16  ;;  %v307_v3 = vld [vmem:[#allocation5 + $0x328] sm:$0xff]  ;;  %v93_v5 = vld [vmem:[#allocation5 + $0x120] sm:$0xff]  ;;  %v92_v8 = vld [vmem:[#allocation5 + $0x118] sm:$0xff]  ;;  %v157_v14 = vrot.slane %v143_v4, %v1056_v48  ;;  %v371_v16 = vrot.slane %v357_v7, %v1056_v48 }
  0x52   :  { %414 = vmatprep.subr.mxu1 %v325_v17  ;;  %201 = vmatpush2.msra.mxu0 %v111_v18  ;;  %v306_v6 = vld [vmem:[#allocation5 + $0x320] sm:$0xff]  ;;  %v305_v9 = vld [vmem:[#allocation5 + $0x318] sm:$0xff]  ;;  %v91_v10 = vld [vmem:[#allocation5 + $0x110] sm:$0xff]  ;;  %v150_v18 = vrot.slane %v142_v58, %v1056_v48 }
  0x53   :  { %415 = vmatpush2.msra.mxu1 %v324_v19  ;;  %202 = vmatprep.subr.mxu0 %v110_v20  ;;  %v304_v11 = vld [vmem:[#allocation5 + $0x310] sm:$0xff]  ;;  %v90_v12 = vld [vmem:[#allocation5 + $0x108] sm:$0xff]  ;;  %v89_v15 = vld [vmem:[#allocation5 + $0x100] sm:$0xff]  ;;  %v364_v19 = vrot.slane %v356_v61, %v1056_v48 }
  0x54   :  { %416 = vmatprep.subr.mxu1 %v323_v21  ;;  %203 = vmatpush2.msra.mxu0 %v109_v25  ;;  %v303_v13 = vld [vmem:[#allocation5 + $0x308] sm:$0xff]  ;;  %v302_v17 = vld [vmem:[#allocation5 + $0x300] sm:$0xff]  ;;  %v512_v20 = vld [vmem:[#allocation5 + $0x4f8] sm:$0xff] }
  0x55   :  { %417 = vmatpush2.msra.mxu1 %v322_v26  ;;  %204 = vmatprep.subr.mxu0 %v108_v27  ;;  %v723_v21 = vld [vmem:[#allocation5 + $0x6f8] sm:$0xff]  ;;  %v511_v23 = vld [vmem:[#allocation5 + $0x4f0] sm:$0xff]  ;;  %v510_v25 = vld [vmem:[#allocation5 + $0x4e8] sm:$0xff] }
  0x56   :  { %418 = vmatprep.subr.mxu1 %v321_v28  ;;  %205 = vmatpush2.msra.mxu0 %v107_v29  ;;  %v722_v24 = vld [vmem:[#allocation5 + $0x6f0] sm:$0xff]  ;;  %v721_v26 = vld [vmem:[#allocation5 + $0x6e8] sm:$0xff]  ;;  %v509_v27 = vld [vmem:[#allocation5 + $0x4e0] sm:$0xff] }
  0x57   :  { %419 = vmatpush2.msra.mxu1 %v320_v30  ;;  %206 = vmatprep.subr.mxu0 %v106_v31  ;;  %v720_v28 = vld [vmem:[#allocation5 + $0x6e0] sm:$0xff]  ;;  %v508_v29 = vld [vmem:[#allocation5 + $0x4d8] sm:$0xff]  ;;  %v507_v31 = vld [vmem:[#allocation5 + $0x4d0] sm:$0xff] }
  0x58   :  { %420 = vmatprep.subr.mxu1 %v319_v32  ;;  %207 = vmatpush2.msra.mxu0 %v105_v33  ;;  %v719_v30 = vld [vmem:[#allocation5 + $0x6d8] sm:$0xff]  ;;  %v718_v32 = vld [vmem:[#allocation5 + $0x6d0] sm:$0xff]  ;;  %v506_v33 = vld [vmem:[#allocation5 + $0x4c8] sm:$0xff] }
  0x59   :  { %421 = vmatpush2.msra.mxu1 %v318_v34  ;;  %208 = vmatprep.subr.mxu0 %v104_v35  ;;  %v717_v34 = vld [vmem:[#allocation5 + $0x6c8] sm:$0xff]  ;;  %v505_v35 = vld [vmem:[#allocation5 + $0x4c0] sm:$0xff]  ;;  %v504_v38 = vld [vmem:[#allocation5 + $0x4b8] sm:$0xff] }
  0x5a   :  { %422 = vmatprep.subr.mxu1 %v317_v36  ;;  %209 = vmatpush2.msra.mxu0 %v103_v43  ;;  %v716_v36 = vld [vmem:[#allocation5 + $0x6c0] sm:$0xff]  ;;  %v715_v39 = vld [vmem:[#allocation5 + $0x6b8] sm:$0xff]  ;;  %v503_v40 = vld [vmem:[#allocation5 + $0x4b0] sm:$0xff] }
  0x5b   :  { %423 = vmatpush2.msra.mxu1 %v316_v44  ;;  %210 = vmatprep.subr.mxu0 %v102_v45  ;;  %v714_v41 = vld [vmem:[#allocation5 + $0x6b0] sm:$0xff]  ;;  %v502_v42 = vld [vmem:[#allocation5 + $0x4a8] sm:$0xff]  ;;  %v501_v44 = vld [vmem:[#allocation5 + $0x4a0] sm:$0xff] }
  0x5c   :  { %424 = vmatprep.subr.mxu1 %v315_v46  ;;  %211 = vmatpush2.msra.mxu0 %v101_v49  ;;  %v713_v43 = vld [vmem:[#allocation5 + $0x6a8] sm:$0xff]  ;;  %v712_v45 = vld [vmem:[#allocation5 + $0x6a0] sm:$0xff]  ;;  %v500_v46 = vld [vmem:[#allocation5 + $0x498] sm:$0xff] }
  0x5d   :  { %425 = vmatpush2.msra.mxu1 %v314_v50  ;;  %212 = vmatprep.subr.mxu0 %v100_v52  ;;  %v711_v47 = vld [vmem:[#allocation5 + $0x698] sm:$0xff]  ;;  %v499_v49 = vld [vmem:[#allocation5 + $0x490] sm:$0xff]  ;;  %v498_v51 = vld [vmem:[#allocation5 + $0x488] sm:$0xff] }
  0x5e   :  { %426 = vmatprep.subr.mxu1 %v313_v53  ;;  %213 = vmatpush2.msra.mxu0 %v99_v54  ;;  %v710_v50 = vld [vmem:[#allocation5 + $0x690] sm:$0xff]  ;;  %v709_v52 = vld [vmem:[#allocation5 + $0x688] sm:$0xff]  ;;  %v497_v53 = vld [vmem:[#allocation5 + $0x480] sm:$0xff] }
  0x5f   :  { %427 = vmatpush2.msra.mxu1 %v312_v55  ;;  %214 = vmatprep.subr.mxu0 %v98_v56  ;;  %v708_v54 = vld [vmem:[#allocation5 + $0x680] sm:$0xff]  ;;  %v496_v55 = vld [vmem:[#allocation5 + $0x478] sm:$0xff]  ;;  %v706_v58 = vld [vmem:[#allocation5 + $0x670] sm:$0xff] }
  0x60   :  { %428 = vmatprep.subr.mxu1 %v311_v57  ;;  %215 = vmatpush2.msra.mxu0 %v97_v59  ;;  %v707_v56 = vld [vmem:[#allocation5 + $0x678] sm:$0xff]  ;;  %v495_v57 = vld [vmem:[#allocation5 + $0x470] sm:$0xff]  ;;  %v494_v59 = vld [vmem:[#allocation5 + $0x468] sm:$0xff] }
  0x61   :  { %429 = vmatpush2.msra.mxu1 %v310_v60  ;;  %216 = vmatprep.subr.mxu0 %v96_v62  ;;  %v705_v60 = vld [vmem:[#allocation5 + $0x668] sm:$0xff]  ;;  %v493_v61 = vld [vmem:[#allocation5 + $0x460] sm:$0xff]  ;;  %v488_v7 = vld [vmem:[#allocation5 + $0x438] sm:$0xff] }
  0x62   :  { %430 = vmatprep.subr.mxu1 %v309_v63  ;;  %217 = vmatpush2.msra.mxu0 %v95_v0  ;;  %v704_v62 = vld [vmem:[#allocation5 + $0x660] sm:$0xff]  ;;  %v492_v63 = vld [vmem:[#allocation5 + $0x458] sm:$0xff]  ;;  %v701_v4 = vld [vmem:[#allocation5 + $0x648] sm:$0xff] }
  0x63   :  { %431 = vmatpush2.msra.mxu1 %v308_v1  ;;  %218 = vmatprep.subr.mxu0 %v94_v2  ;;  %v703_v0 = vld [vmem:[#allocation5 + $0x658] sm:$0xff]  ;;  %v491_v1 = vld [vmem:[#allocation5 + $0x450] sm:$0xff]  ;;  %v546_v22 = vld [vmem:[#allocation7 + $0x2] ss:$4 sm:$0x3] }
  0x64   :  { %432 = vmatprep.subr.mxu1 %v307_v3  ;;  %219 = vmatpush2.msra.mxu0 %v93_v5  ;;  %v702_v2 = vld [vmem:[#allocation5 + $0x650] sm:$0xff]  ;;  %v490_v3 = vld [vmem:[#allocation5 + $0x448] sm:$0xff]  ;;  %v489_v5 = vld [vmem:[#allocation5 + $0x440] sm:$0xff] }
  0x65   :  { %433 = vmatpush2.msra.mxu1 %v306_v6  ;;  %220 = vmatprep.subr.mxu0 %v92_v8  ;;  %v700_v6 = vld [vmem:[#allocation5 + $0x640] sm:$0xff]  ;;  %v699_v8 = vld [vmem:[#allocation5 + $0x638] sm:$0xff] }
  0x66   :  { %434 = vmatprep.subr.mxu1 %v305_v9  ;;  %221 = vmatpush2.msra.mxu0 %v91_v10  ;;  %v487_v9 = vld [vmem:[#allocation5 + $0x430] sm:$0xff] }
  0x67   :  { %435 = vmatpush2.msra.mxu1 %v304_v11  ;;  %222 = vmatprep.subr.mxu0 %v90_v12  ;;  %v698_v10 = vld [vmem:[#allocation5 + $0x630] sm:$0xff]  ;;  %v486_v11 = vld [vmem:[#allocation5 + $0x428] sm:$0xff] }
  0x68   :  { %436 = vmatprep.subr.mxu1 %v303_v13  ;;  %223 = vmatpush2.msra.mxu0 %v89_v15  ;;  %v697_v12 = vld [vmem:[#allocation5 + $0x628] sm:$0xff]  ;;  %v485_v13 = vld [vmem:[#allocation5 + $0x420] sm:$0xff]  ;;  %v484_v15 = vld [vmem:[#allocation5 + $0x418] sm:$0xff] }
  0x69   :  { %224 = vmatprep.mubr.f32.mxu0 %v157_v14  ;;  %437 = vmatpush2.msra.mxu1 %v302_v17  ;;  %v696_v14 = vld [vmem:[#allocation5 + $0x620] sm:$0xff]  ;;  %v483_v17 = vld [vmem:[#allocation5 + $0x410] sm:$0xff] }
  0x6a   :  { %438 = vmatprep.mubr.f32.mxu1 %v371_v16  ;;  %225 = vmatmul.mubr.f32.vlgmr.msra.gmra.mxu0 %v150_v18  ;;  %v695_v16 = vld [vmem:[#allocation5 + $0x618] sm:$0xff]  ;;  %v694_v18 = vld [vmem:[#allocation5 + $0x610] sm:$0xff] }
  0x6b   :  { %439 = vmatmul.mubr.f32.vlgmr.msra.gmra.mxu1 %v364_v19  ;;  %585 = vmatprep.subr.mxu0 %v512_v20  ;;  %v482_v19 = vld [vmem:[#allocation5 + $0x408] sm:$0xff] }
  0x6c   :  { %796 = vmatprep.subr.mxu1 %v723_v21  ;;  %586 = vmatpush1.msra.mxu0 %v511_v23  ;;  %v693_v20 = vld [vmem:[#allocation5 + $0x608] sm:$0xff]  ;;  %v481_v21 = vld [vmem:[#allocation5 + $0x400] sm:$0xff] }
  0x6d   :  { %797 = vmatpush1.msra.mxu1 %v722_v24  ;;  %587 = vmatprep.subr.mxu0 %v510_v25  ;;  %v692_v23 = vld [vmem:[#allocation5 + $0x600] sm:$0xff]  ;;  %v544_v24 = vld [vmem:[#allocation5 + $0x5f8] sm:$0xff] }
  0x6e   :  { %798 = vmatprep.subr.mxu1 %v721_v26  ;;  %588 = vmatpush1.msra.mxu0 %v509_v27  ;;  %v755_v25 = vld [vmem:[#allocation5 + $0x7f8] sm:$0xff]  ;;  %v543_v26 = vld [vmem:[#allocation5 + $0x5f0] sm:$0xff] }
  0x6f   :  { %799 = vmatpush1.msra.mxu1 %v720_v28  ;;  %589 = vmatprep.subr.mxu0 %v508_v29  ;;  %v754_v27 = vld [vmem:[#allocation5 + $0x7f0] sm:$0xff]  ;;  %v542_v28 = vld [vmem:[#allocation5 + $0x5e8] sm:$0xff] }
  0x70   :  { %800 = vmatprep.subr.mxu1 %v719_v30  ;;  %590 = vmatpush1.msra.mxu0 %v507_v31  ;;  %v753_v29 = vld [vmem:[#allocation5 + $0x7e8] sm:$0xff]  ;;  %v541_v30 = vld [vmem:[#allocation5 + $0x5e0] sm:$0xff] }
  0x71   :  { %801 = vmatpush1.msra.mxu1 %v718_v32  ;;  %591 = vmatprep.subr.mxu0 %v506_v33  ;;  %v752_v31 = vld [vmem:[#allocation5 + $0x7e0] sm:$0xff]  ;;  %v540_v32 = vld [vmem:[#allocation5 + $0x5d8] sm:$0xff] }
  0x72   :  { %802 = vmatprep.subr.mxu1 %v717_v34  ;;  %592 = vmatpush1.msra.mxu0 %v505_v35  ;;  %v751_v33 = vld [vmem:[#allocation5 + $0x7d8] sm:$0xff]  ;;  %v539_v34 = vld [vmem:[#allocation5 + $0x5d0] sm:$0xff] }
  0x73   :  { %803 = vmatpush1.msra.mxu1 %v716_v36  ;;  %593 = vmatprep.subr.mxu0 %v504_v38  ;;  %v750_v35 = vld [vmem:[#allocation5 + $0x7d0] sm:$0xff]  ;;  %v538_v36 = vld [vmem:[#allocation5 + $0x5c8] sm:$0xff] }
  0x74   :  { %804 = vmatprep.subr.mxu1 %v715_v39  ;;  %594 = vmatpush1.msra.mxu0 %v503_v40  ;;  %v749_v38 = vld [vmem:[#allocation5 + $0x7c8] sm:$0xff]  ;;  %v537_v39 = vld [vmem:[#allocation5 + $0x5c0] sm:$0xff] }
  0x75   :  { %805 = vmatpush1.msra.mxu1 %v714_v41  ;;  %595 = vmatprep.subr.mxu0 %v502_v42  ;;  %v748_v40 = vld [vmem:[#allocation5 + $0x7c0] sm:$0xff]  ;;  %v536_v41 = vld [vmem:[#allocation5 + $0x5b8] sm:$0xff] }
  0x76   :  { %806 = vmatprep.subr.mxu1 %v713_v43  ;;  %596 = vmatpush1.msra.mxu0 %v501_v44  ;;  %v747_v42 = vld [vmem:[#allocation5 + $0x7b8] sm:$0xff]  ;;  %v535_v43 = vld [vmem:[#allocation5 + $0x5b0] sm:$0xff] }
  0x77   :  { %807 = vmatpush1.msra.mxu1 %v712_v45  ;;  %597 = vmatprep.subr.mxu0 %v500_v46  ;;  %v746_v44 = vld [vmem:[#allocation5 + $0x7b0] sm:$0xff]  ;;  %v534_v45 = vld [vmem:[#allocation5 + $0x5a8] sm:$0xff] }
  0x78   :  { %808 = vmatprep.subr.mxu1 %v711_v47  ;;  %598 = vmatpush1.msra.mxu0 %v499_v49  ;;  %v745_v46 = vld [vmem:[#allocation5 + $0x7a8] sm:$0xff]  ;;  %v533_v47 = vld [vmem:[#allocation5 + $0x5a0] sm:$0xff] }
  0x79   :  { %809 = vmatpush1.msra.mxu1 %v710_v50  ;;  %599 = vmatprep.subr.mxu0 %v498_v51  ;;  %v744_v49 = vld [vmem:[#allocation5 + $0x7a0] sm:$0xff]  ;;  %v532_v50 = vld [vmem:[#allocation5 + $0x598] sm:$0xff] }
  0x7a   :  { %810 = vmatprep.subr.mxu1 %v709_v52  ;;  %600 = vmatpush1.msra.mxu0 %v497_v53  ;;  %v743_v51 = vld [vmem:[#allocation5 + $0x798] sm:$0xff]  ;;  %v531_v52 = vld [vmem:[#allocation5 + $0x590] sm:$0xff] }
  0x7b   :  { %811 = vmatpush1.msra.mxu1 %v708_v54  ;;  %601 = vmatprep.subr.mxu0 %v496_v55  ;;  %v742_v53 = vld [vmem:[#allocation5 + $0x790] sm:$0xff]  ;;  %v530_v54 = vld [vmem:[#allocation5 + $0x588] sm:$0xff] }
  0x7c   :  { %812 = vmatprep.subr.mxu1 %v707_v56  ;;  %602 = vmatpush1.msra.mxu0 %v495_v57  ;;  %v741_v55 = vld [vmem:[#allocation5 + $0x788] sm:$0xff]  ;;  %v529_v56 = vld [vmem:[#allocation5 + $0x580] sm:$0xff] }
  0x7d   :  { %813 = vmatpush1.msra.mxu1 %v706_v58  ;;  %603 = vmatprep.subr.mxu0 %v494_v59  ;;  %v740_v57 = vld [vmem:[#allocation5 + $0x780] sm:$0xff]  ;;  %v528_v58 = vld [vmem:[#allocation5 + $0x578] sm:$0xff] }
  0x7e   :  { %814 = vmatprep.subr.mxu1 %v705_v60  ;;  %604 = vmatpush1.msra.mxu0 %v493_v61  ;;  %v739_v59 = vld [vmem:[#allocation5 + $0x778] sm:$0xff]  ;;  %v477_v60 = vld [vmem:[#allocation2 + $0x2] ss:$4 sm:$0x3] }
  0x7f   :  { %815 = vmatpush1.msra.mxu1 %v704_v62  ;;  %605 = vmatprep.subr.mxu0 %v492_v63  ;;  %v479_v61 = vld [vmem:[#allocation2 + $0xa] ss:$4 sm:$0x3]  ;;  %v688_v62 = vld [vmem:[#allocation2 + $0x3] ss:$4 sm:$0x3] }
  0x80   :  { %816 = vmatprep.subr.mxu1 %v703_v0  ;;  %606 = vmatpush1.msra.mxu0 %v491_v1  ;;  %v690_v63 = vld [vmem:[#allocation2 + $0xb] ss:$4 sm:$0x3]  ;;  %v527_v0 = vld [vmem:[#allocation5 + $0x570] sm:$0xff] }
  0x81   :  { %817 = vmatpush1.msra.mxu1 %v702_v2  ;;  %607 = vmatprep.subr.mxu0 %v490_v3  ;;  %v738_v1 = vld [vmem:[#allocation5 + $0x770] sm:$0xff]  ;;  %v526_v2 = vld [vmem:[#allocation5 + $0x568] sm:$0xff] }
  0x82   :  { %818 = vmatprep.subr.mxu1 %v701_v4  ;;  %608 = vmatpush1.msra.mxu0 %v489_v5  ;;  %v737_v3 = vld [vmem:[#allocation5 + $0x768] sm:$0xff]  ;;  %v560_v4 = vcombine.low %v477_v60, %v479_v61  ;;  %v525_v5 = vld [vmem:[#allocation5 + $0x560] sm:$0xff] }
  0x83   :  { %819 = vmatpush1.msra.mxu1 %v700_v6  ;;  %609 = vmatprep.subr.mxu0 %v488_v7  ;;  %v736_v6 = vld [vmem:[#allocation5 + $0x760] sm:$0xff]  ;;  %v771_v7 = vcombine.low %v688_v62, %v690_v63 }
  0x84   :  { %820 = vmatprep.subr.mxu1 %v699_v8  ;;  %610 = vmatpush1.msra.mxu0 %v487_v9  ;;  %v524_v8 = vld [vmem:[#allocation5 + $0x558] sm:$0xff] }
  0x85   :  { %821 = vmatpush1.msra.mxu1 %v698_v10  ;;  %611 = vmatprep.subr.mxu0 %v486_v11  ;;  %v735_v9 = vld [vmem:[#allocation5 + $0x758] sm:$0xff]  ;;  %v523_v10 = vld [vmem:[#allocation5 + $0x550] sm:$0xff] }
  0x86   :  { %822 = vmatprep.subr.mxu1 %v697_v12  ;;  %612 = vmatpush1.msra.mxu0 %v485_v13  ;;  %v734_v11 = vld [vmem:[#allocation5 + $0x750] sm:$0xff]  ;;  %v522_v12 = vld [vmem:[#allocation5 + $0x548] sm:$0xff] }
  0x87   :  { %823 = vmatpush1.msra.mxu1 %v696_v14  ;;  %613 = vmatprep.subr.mxu0 %v484_v15  ;;  %v733_v13 = vld [vmem:[#allocation5 + $0x748] sm:$0xff]  ;;  %v567_v14 = vrot.slane %v560_v4, %v1056_v48  ;;  %v521_v15 = vld [vmem:[#allocation5 + $0x540] sm:$0xff] }
  0x88   :  { %824 = vmatprep.subr.mxu1 %v695_v16  ;;  %614 = vmatpush1.msra.mxu0 %v483_v17  ;;  %v732_v16 = vld [vmem:[#allocation5 + $0x740] sm:$0xff]  ;;  %v778_v17 = vrot.slane %v771_v7, %v1056_v48 }
  0x89   :  { %825 = vmatpush1.msra.mxu1 %v694_v18  ;;  %615 = vmatprep.subr.mxu0 %v482_v19  ;;  %v520_v18 = vld [vmem:[#allocation5 + $0x538] sm:$0xff] }
  0x8a   :  { %826 = vmatprep.subr.mxu1 %v693_v20  ;;  %616 = vmatpush1.msra.mxu0 %v481_v21  ;;  %v731_v19 = vld [vmem:[#allocation5 + $0x738] sm:$0xff]  ;;  %v519_v20 = vld [vmem:[#allocation5 + $0x530] sm:$0xff] }
  0x8b   :  { %827 = vmatpush1.msra.mxu1 %v692_v23  ;;  %617 = vmatprep.subr.mxu0 %v544_v24  ;;  %v730_v21 = vld [vmem:[#allocation5 + $0x730] sm:$0xff]  ;;  %v518_v23 = vld [vmem:[#allocation5 + $0x528] sm:$0xff] }
  0x8c   :  { %828 = vmatprep.subr.mxu1 %v755_v25  ;;  %618 = vmatpush2.msra.mxu0 %v543_v26  ;;  %v729_v24 = vld [vmem:[#allocation5 + $0x728] sm:$0xff]  ;;  %v568_v25 = vcombine.high %v567_v14, %v567_v14  ;;  %v517_v26 = vld [vmem:[#allocation5 + $0x520] sm:$0xff] }
  0x8d   :  { %829 = vmatpush2.msra.mxu1 %v754_v27  ;;  %619 = vmatprep.subr.mxu0 %v542_v28  ;;  %v728_v27 = vld [vmem:[#allocation5 + $0x720] sm:$0xff]  ;;  %v779_v28 = vcombine.high %v778_v17, %v778_v17 }
  0x8e   :  { %830 = vmatprep.subr.mxu1 %v753_v29  ;;  %620 = vmatpush2.msra.mxu0 %v541_v30  ;;  %v516_v29 = vld [vmem:[#allocation5 + $0x518] sm:$0xff] }
  0x8f   :  { %831 = vmatpush2.msra.mxu1 %v752_v31  ;;  %621 = vmatprep.subr.mxu0 %v540_v32  ;;  %v727_v30 = vld [vmem:[#allocation5 + $0x718] sm:$0xff]  ;;  %v515_v31 = vld [vmem:[#allocation5 + $0x510] sm:$0xff] }
  0x90   :  { %832 = vmatprep.subr.mxu1 %v751_v33  ;;  %622 = vmatpush2.msra.mxu0 %v539_v34  ;;  %v726_v32 = vld [vmem:[#allocation5 + $0x710] sm:$0xff]  ;;  %v514_v33 = vld [vmem:[#allocation5 + $0x508] sm:$0xff] }
  0x91   :  { %833 = vmatpush2.msra.mxu1 %v750_v35  ;;  %623 = vmatprep.subr.mxu0 %v538_v36  ;;  %v725_v34 = vld [vmem:[#allocation5 + $0x708] sm:$0xff]  ;;  %v582_v35 = vrot.slane %v568_v25, %v1056_v48  ;;  %v513_v36 = vld [vmem:[#allocation5 + $0x500] sm:$0xff] }
  0x92   :  { %834 = vmatprep.subr.mxu1 %v749_v38  ;;  %624 = vmatpush2.msra.mxu0 %v537_v39  ;;  %v793_v38 = vrot.slane %v779_v28, %v1056_v48  ;;  %v724_v39 = vld [vmem:[#allocation5 + $0x700] sm:$0xff] }
  0x93   :  { %835 = vmatpush2.msra.mxu1 %v748_v40  ;;  %625 = vmatprep.subr.mxu0 %v536_v41  ;;  %v575_v40 = vrot.slane %v567_v14, %v1056_v48  ;;  %v786_v41 = vrot.slane %v778_v17, %v1056_v48 }
  0x94   :  { %836 = vmatprep.subr.mxu1 %v747_v42  ;;  %626 = vmatpush2.msra.mxu0 %v535_v43  ;;  %v125_v42 = vsub.s32 0, %v1053_v37  ;;  %v121_v43 = vld [vmem:[#allocation7] ss:$4 sm:$0x3] }
  0x95   :  { %837 = vmatpush2.msra.mxu1 %v746_v44  ;;  %627 = vmatprep.subr.mxu0 %v534_v45  ;;  %v335_v44 = vld [vmem:[#allocation7 + $0x1] ss:$4 sm:$0x3]  ;;  %v129_v45 = vsub.s32 1, %v1053_v37 }
  0x96   :  { %838 = vmatprep.subr.mxu1 %v745_v46  ;;  %628 = vmatpush2.msra.mxu0 %v533_v47  ;;  %v126_v46 = vrot.slane %v121_v43, %v125_v42  ;;  %v340_v47 = vrot.slane %v335_v44, %v125_v42 }
  0x97   :  { %839 = vmatpush2.msra.mxu1 %v744_v49  ;;  %629 = vmatprep.subr.mxu0 %v532_v50  ;;  %v130_v49 = vrot.slane %v121_v43, %v129_v45  ;;  %v344_v50 = vrot.slane %v335_v44, %v129_v45 }
  0x98   :  { %840 = vmatprep.subr.mxu1 %v743_v51  ;;  %630 = vmatpush2.msra.mxu0 %v531_v52 }
  0x99   :  { %841 = vmatpush2.msra.mxu1 %v742_v53  ;;  %631 = vmatprep.subr.mxu0 %v530_v54 }
  0x9a   :  { %842 = vmatprep.subr.mxu1 %v741_v55  ;;  %632 = vmatpush2.msra.mxu0 %v529_v56 }
  0x9b   :  { %843 = vmatpush2.msra.mxu1 %v740_v57  ;;  %633 = vmatprep.subr.mxu0 %v528_v58 }
  0x9c   :  { %844 = vmatprep.subr.mxu1 %v739_v59  ;;  %634 = vmatpush2.msra.mxu0 %v527_v0 }
  0x9d   :  { %845 = vmatpush2.msra.mxu1 %v738_v1  ;;  %635 = vmatprep.subr.mxu0 %v526_v2 }
  0x9e   :  { %846 = vmatprep.subr.mxu1 %v737_v3  ;;  %636 = vmatpush2.msra.mxu0 %v525_v5  ;;  %v757_v5 = vld [vmem:[#allocation7 + $0x3] ss:$4 sm:$0x3] }
  0x9f   :  { %847 = vmatpush2.msra.mxu1 %v736_v6  ;;  %637 = vmatprep.subr.mxu0 %v524_v8  ;;  %v551_v6 = vrot.slane %v546_v22, %v125_v42  ;;  %v762_v7 = vrot.slane %v757_v5, %v125_v42  ;;  %v555_v8 = vrot.slane %v546_v22, %v129_v45 }
  0xa0   :  { %848 = vmatprep.subr.mxu1 %v735_v9  ;;  %638 = vmatpush2.msra.mxu0 %v523_v10  ;;  %v766_v9 = vrot.slane %v757_v5, %v129_v45 }
  0xa1   :  { %849 = vmatpush2.msra.mxu1 %v734_v11  ;;  %639 = vmatprep.subr.mxu0 %v522_v12 }
  0xa2   :  { %850 = vmatprep.subr.mxu1 %v733_v13  ;;  %640 = vmatpush2.msra.mxu0 %v521_v15 }
  0xa3   :  { %851 = vmatpush2.msra.mxu1 %v732_v16  ;;  %641 = vmatprep.subr.mxu0 %v520_v18 }
  0xa4   :  { %852 = vmatprep.subr.mxu1 %v731_v19  ;;  %642 = vmatpush2.msra.mxu0 %v519_v20 }
  0xa5   :  { %853 = vmatpush2.msra.mxu1 %v730_v21  ;;  %643 = vmatprep.subr.mxu0 %v518_v23 }
  0xa6   :  { %854 = vmatprep.subr.mxu1 %v729_v24  ;;  %644 = vmatpush2.msra.mxu0 %v517_v26 }
  0xa7   :  { %855 = vmatpush2.msra.mxu1 %v728_v27  ;;  %645 = vmatprep.subr.mxu0 %v516_v29 }
  0xa8   :  { %856 = vmatprep.subr.mxu1 %v727_v30  ;;  %646 = vmatpush2.msra.mxu0 %v515_v31 }
  0xa9   :  { %857 = vmatpush2.msra.mxu1 %v726_v32  ;;  %647 = vmatprep.subr.mxu0 %v514_v33 }
  0xaa   :  { %858 = vmatprep.subr.mxu1 %v725_v34  ;;  %648 = vmatpush2.msra.mxu0 %v513_v36 }
  0xab   :  { %649 = vmatprep.mubr.f32.mxu0 %v582_v35  ;;  %859 = vmatpush2.msra.mxu1 %v724_v39 }
  0xac   :  { %860 = vmatprep.mubr.f32.mxu1 %v793_v38  ;;  %650 = vmatmul.mubr.f32.vlgmr.msra.gmra.mxu0 %v575_v40 }
  0xad   :  { %861 = vmatmul.mubr.f32.vlgmr.msra.gmra.mxu1 %v786_v41 }
 0x12a   :  { %v226_v51 = vpop.f32.mrf.mxu0 }
 0x12b   :  { %v440_v52 = vpop.f32.mrf.mxu1  ;;  %v227_v53 = vadd.f32 %v226_v51, %v126_v46 }
 0x12c   :  { %v441_v54 = vadd.f32 %v440_v52, %v340_v47  ;;  %v228_v55 = vpop.f32.mrf.mxu0 }
 0x12d   :  { %v442_v56 = vpop.f32.mrf.mxu1  ;;  %v229_v57 = vadd.f32 %v228_v55, %v130_v49 }
 0x12e   :  { %v443_v58 = vadd.f32 %v442_v56, %v344_v50 }
 0x12f   :  { %v233_v59 = vcombine.low %v227_v53, %v229_v57 }
 0x130   :  { %v447_v60 = vcombine.low %v441_v54, %v443_v58 }
 0x131   :  { %v240_v61 = vrot.slane %v233_v59, %v1056_v48 }
 0x132   :  { %v454_v62 = vrot.slane %v447_v60, %v1056_v48 }
 0x133   :  { %v241_v63 = vcombine.high %v240_v61, %v240_v61  ;;  %v248_v0 = vrot.slane %v240_v61, %v1056_v48 }
 0x134   :  { %v455_v1 = vcombine.high %v454_v62, %v454_v62  ;;  %v462_v2 = vrot.slane %v454_v62, %v1056_v48 }
 0x135   :  { %v255_v3 = vrot.slane %v241_v63, %v1056_v48  ;;  %262 = vst.msk [vmem:[#allocation8] ss:$4 sm:$0x3] %vm1075_vm0, %v248_v0 }
 0x136   :  { %v469_v4 = vrot.slane %v455_v1, %v1056_v48  ;;  %473 = vst.msk [vmem:[#allocation8 + $0x1] ss:$4 sm:$0x3] %vm1075_vm0, %v462_v2 }
 0x137   :  { %264 = vst.msk [vmem:[#allocation8 + $0x8] ss:$4 sm:$0x3] %vm1075_vm0, %v255_v3 }
 0x138   :  { %475 = vst.msk [vmem:[#allocation8 + $0x9] ss:$4 sm:$0x3] %vm1075_vm0, %v469_v4 }
 0x16c   :  { %v651_v10 = vpop.f32.mrf.mxu0 }
 0x16d   :  { %v862_v11 = vpop.f32.mrf.mxu1  ;;  %v652_v14 = vadd.f32 %v651_v10, %v551_v6 }
 0x16e   :  { %v653_v12 = vpop.f32.mrf.mxu0  ;;  %v863_v15 = vadd.f32 %v862_v11, %v762_v7 }
 0x16f   :  { %v864_v13 = vpop.f32.mrf.mxu1  ;;  %v654_v16 = vadd.f32 %v653_v12, %v555_v8 }
 0x170   :  { %v865_v17 = vadd.f32 %v864_v13, %v766_v9 }
 0x171   :  { %v658_v18 = vcombine.low %v652_v14, %v654_v16 }
 0x172   :  { %v869_v19 = vcombine.low %v863_v15, %v865_v17 }
 0x173   :  { %v665_v20 = vrot.slane %v658_v18, %v1056_v48 }
 0x174   :  { %v876_v21 = vrot.slane %v869_v19, %v1056_v48 }
 0x175   :  { %v666_v23 = vcombine.high %v665_v20, %v665_v20  ;;  %v673_v24 = vrot.slane %v665_v20, %v1056_v48 }
 0x176   :  { %v877_v25 = vcombine.high %v876_v21, %v876_v21  ;;  %v884_v26 = vrot.slane %v876_v21, %v1056_v48 }
 0x177   :  { %v680_v27 = vrot.slane %v666_v23, %v1056_v48  ;;  %684 = vst.msk [vmem:[#allocation8 + $0x2] ss:$4 sm:$0x3] %vm1075_vm0, %v673_v24 }
 0x178   :  { %v891_v28 = vrot.slane %v877_v25, %v1056_v48  ;;  %895 = vst.msk [vmem:[#allocation8 + $0x3] ss:$4 sm:$0x3] %vm1075_vm0, %v884_v26 }
 0x179   :  { %686 = vst.msk [vmem:[#allocation8 + $0xa] ss:$4 sm:$0x3] %vm1075_vm0, %v680_v27 }
 0x17a   :  { %897 = vst.msk [vmem:[#allocation8 + $0xb] ss:$4 sm:$0x3] %vm1075_vm0, %v891_v28 }
 0x17b   :  { %996 = shalt.err (!%p993_p5)
}
 0x17c   :  { %909 = dma.vmem_to_hbm [thread:$0]  %s904_s2, 256, %s1114_s3, [#allocation4], %s1015_s22, %s1015_s22, %s1016_s23  }
 0x17d   :  { %1009 = dma.done.wait [#allocation4], 256  }
 0x17e   :  { %1010 = vsyncadd [#allocation4], 4294967040 }
 0x17f   :  { %913 = vsyncpa [#allocation3], 1 }
 0x180   :  { %914 = vsyncpa [#allocation6], 1 }
 0x181   :  { %915 = vsyncpa [#allocation4], 1 }

</bundles_post_ra>
